<compile_context>
chip_gen: v5e
topology: v5e:2x2
jax: 0.10.0
libtpu: 0.0.40
codegen_flags: <defaults>
</compile_context>

<pallas_src>
import math

import jax
import jax.numpy as jnp
import numpy as np
from jax.experimental import pallas as pl
from jax.experimental.pallas import tpu as pltpu

# ---- problem sizes (small, consistent with the module) -----------------
B = 2            # batch
L = 8            # sequence length
D = 32           # d_model
H = 4            # attention heads
DH = D // H      # head dim
DFF = 4 * D      # d_ff = 4 * d_model (module default)
EPS = 1e-5       # nn.LayerNorm default eps
SCALE = 1.0 / math.sqrt(DH)


def _layer_norm(z, gamma, beta):
    mu = jnp.mean(z, axis=-1, keepdims=True)
    var = jnp.mean((z - mu) ** 2, axis=-1, keepdims=True)
    return (z - mu) * jax.lax.rsqrt(var + EPS) * gamma + beta


def encoder_layer_kernel(x_ref, wqkv_ref, bqkv_ref, wo_ref, bo_ref,
                         w1_ref, b1_ref, w2_ref, b2_ref,
                         g1_ref, be1_ref, g2_ref, be2_ref,
                         o_ref):
    """Whole (B, L, D) batch in one invocation:
    MHA + residual + LN1 + FFN + residual + LN2."""
    x = x_ref[...].astype(jnp.float32)                 # (B, L, D)
    xf = x.reshape(B * L, D)                           # merge leading dims (free)

    # ---- fused QKV projection (SCALE already folded into Q cols/bias) ---
    qkv = jnp.dot(xf, wqkv_ref[...],
                  preferred_element_type=jnp.float32) + bqkv_ref[...]  # (B*L, 3D)
    q = qkv[:, 0 * D:1 * D]
    k = qkv[:, 1 * D:2 * D]
    v = qkv[:, 2 * D:3 * D]

    # ---- head split: (B*L, D) -> (H*B, L, DH) ----------------------------
    # H lane slices + ONE major-axis stack per tensor (no per-(b,h) tiles,
    # no row slicing, no transpose).
    def split_heads(t):
        t3 = t.reshape(B, L, D)
        return jnp.stack([t3[:, :, h * DH:(h + 1) * DH] for h in range(H)],
                         axis=0).reshape(H * B, L, DH)

    qh, kh, vh = split_heads(q), split_heads(k), split_heads(v)

    # ---- one batched contraction pair over the (H*B) head-batch ----------
    s = jnp.einsum("nqd,nkd->nqk", qh, kh,
                   preferred_element_type=jnp.float32)          # (H*B, L, L)
    s = s - jnp.max(s, axis=-1, keepdims=True)
    p = jnp.exp(s)
    ctx = jnp.einsum("nqk,nkd->nqd", p, vh,
                     preferred_element_type=jnp.float32)        # (H*B, L, DH)
    # Post-PV normalization: scale the (H*B, L, DH) context instead of the
    # (H*B, L, L) probabilities; reciprocal runs on the EUP slot.
    ctx = ctx * pl.reciprocal(jnp.sum(p, axis=-1, keepdims=True), approx=True)

    # ---- head merge: (H*B, L, DH) -> (B*L, D) -----------------------------
    ctx4 = ctx.reshape(H, B, L, DH)                    # major split (free)
    ctx_m = jnp.concatenate([ctx4[h] for h in range(H)], axis=-1)   # (B, L, D)
    ctx_m = ctx_m.reshape(B * L, D)

    attn_out = jnp.dot(ctx_m, wo_ref[...],
                       preferred_element_type=jnp.float32) + bo_ref[...]

    # ---- x = norm1(x + attn_out) ------------------------------------------
    x1 = _layer_norm(xf + attn_out, g1_ref[...], be1_ref[...])

    # ---- FFN: conv1(k=1) -> relu -> conv2(k=1); dropout == identity -------
    hdn = jnp.dot(x1, w1_ref[...], preferred_element_type=jnp.float32) + b1_ref[...]
    hdn = jnp.maximum(hdn, 0.0)
    ff = jnp.dot(hdn, w2_ref[...], preferred_element_type=jnp.float32) + b2_ref[...]

    # ---- out = norm2(x1 + ff) ----------------------------------------------
    x2 = _layer_norm(x1 + ff, g2_ref[...], be2_ref[...])
    o_ref[...] = x2.reshape(B, L, D).astype(o_ref.dtype)


def encoder_layer(x, kp):
    """x: (B, L, D) float32.  kp: fused kernel params (see fuse_params)."""
    args = (x, kp["wqkv"], kp["bqkv"], kp["wo"], kp["bo"],
            kp["w1"], kp["b1"], kp["w2"], kp["b2"],
            kp["g1"], kp["be1"], kp["g2"], kp["be2"])
    # No grid: single invocation, whole arrays resident in VMEM — no
    # pipeline prologue/epilogue scaffolding for a size-1 grid.
    return pl.pallas_call(
        encoder_layer_kernel,
        out_shape=jax.ShapeDtypeStruct(x.shape, x.dtype),
        in_specs=[pl.BlockSpec(memory_space=pltpu.MemorySpace.VMEM)
                  for _ in args],
        out_specs=pl.BlockSpec(memory_space=pltpu.MemorySpace.VMEM),
    )(*args)


def init_params(key):
    """PyTorch-layout parameters (weights as (in, out), biases 1-D)."""
    ks = jax.random.split(key, 12)
    scl = 0.02
    return {
        # attention projections (nn.Linear, bias=True)
        "wq": jax.random.normal(ks[0], (D, D), jnp.float32) * scl,
        "bq": jax.random.normal(ks[1], (D,), jnp.float32) * scl,
        "wk": jax.random.normal(ks[2], (D, D), jnp.float32) * scl,
        "bk": jax.random.normal(ks[3], (D,), jnp.float32) * scl,
        "wv": jax.random.normal(ks[4], (D, D), jnp.float32) * scl,
        "bv": jax.random.normal(ks[5], (D,), jnp.float32) * scl,
        "wo": jax.random.normal(ks[6], (D, D), jnp.float32) * scl,
        "bo": jax.random.normal(ks[7], (D,), jnp.float32) * scl,
        # conv1: nn.Conv1d(D, DFF, 1) weight (DFF, D, 1) -> (D, DFF) here
        "w1": jax.random.normal(ks[8], (D, DFF), jnp.float32) * scl,
        "b1": jax.random.normal(ks[9], (DFF,), jnp.float32) * scl,
        # conv2: nn.Conv1d(DFF, D, 1) weight (D, DFF, 1) -> (DFF, D) here
        "w2": jax.random.normal(ks[10], (DFF, D), jnp.float32) * scl,
        "b2": jax.random.normal(ks[11], (D,), jnp.float32) * scl,
        # layer norms
        "g1": jnp.ones((D,), jnp.float32), "be1": jnp.zeros((D,), jnp.float32),
        "g2": jnp.ones((D,), jnp.float32), "be2": jnp.zeros((D,), jnp.float32),
    }


def fuse_params(p):
    """One-time (outside the per-call path) kernel-param preparation:
    fuse Q/K/V into a single (D, 3D) matrix, fold SCALE into the Q columns
    and Q bias, and lift biases / LN params to 2-D (1, N) for lane layout."""
    wqkv = jnp.concatenate([p["wq"] * SCALE, p["wk"], p["wv"]], axis=1)
    bqkv = jnp.concatenate([p["bq"] * SCALE, p["bk"], p["bv"]])[None, :]
    return {
        "wqkv": wqkv, "bqkv": bqkv,
        "wo": p["wo"], "bo": p["bo"][None, :],
        "w1": p["w1"], "b1": p["b1"][None, :],
        "w2": p["w2"], "b2": p["b2"][None, :],
        "g1": p["g1"][None, :], "be1": p["be1"][None, :],
        "g2": p["g2"][None, :], "be2": p["be2"][None, :],
    }


def encoder_layer_ref(x, p):
    """Pure-JAX reference mirroring the PyTorch forward (dropout = identity)."""
    q = x @ p["wq"] + p["bq"]
    k = x @ p["wk"] + p["bk"]
    v = x @ p["wv"] + p["bv"]
    qh = q.reshape(B, L, H, DH)
    kh = k.reshape(B, L, H, DH)
    vh = v.reshape(B, L, H, DH)
    s = jnp.einsum("blhe,bmhe->bhlm", qh, kh) / math.sqrt(DH)
    pr = jax.nn.softmax(s, axis=-1)
    ctx = jnp.einsum("bhlm,bmhe->blhe", pr, vh).reshape(B, L, D)
    attn_out = ctx @ p["wo"] + p["bo"]

    def ln(z, g, b):
        mu = z.mean(-1, keepdims=True)
        var = ((z - mu) ** 2).mean(-1, keepdims=True)
        return (z - mu) / jnp.sqrt(var + EPS) * g + b

    x1 = ln(x + attn_out, p["g1"], p["be1"])
    hdn = jnp.maximum(x1 @ p["w1"] + p["b1"], 0.0)
    ff = hdn @ p["w2"] + p["b2"]
    return ln(x1 + ff, p["g2"], p["be2"])


if __name__ == "__main__":
    key = jax.random.PRNGKey(0)
    kx, kp = jax.random.split(key)
    x = jax.random.normal(kx, (B, L, D), jnp.float32)
    params = init_params(kp)
    kparams = fuse_params(params)          # hoisted: fused once, not per call

    out = jax.block_until_ready(encoder_layer(x, kparams))
    ref = jax.block_until_ready(encoder_layer_ref(x, params))

    assert out.shape == (B, L, D) and out.dtype == jnp.float32
    # Tolerance accounts for the EUP approx reciprocal in the softmax
    # normalization (deliberate perf choice, ~1e-3 relative); structural or
    # weight-layout errors would be orders of magnitude larger.
    np.testing.assert_allclose(np.asarray(out), np.asarray(ref),
                               atol=2e-3, rtol=2e-3)

    # TODO(synk): dropout is the identity here (inference); training-mode
    # dropout would use pltpu.prng_seed / pltpu.prng_random_bits in-kernel.
    print("KERNEL_OK")
</pallas_src>

<mosaic_0001>
module attributes {stable_mosaic.version = 11 : i64} {
  func.func @encoder_layer_kernel(%arg0: memref<2x8x32xf32, #tpu.memory_space<vmem>>, %arg1: memref<32x96xf32, #tpu.memory_space<vmem>>, %arg2: memref<1x96xf32, #tpu.memory_space<vmem>>, %arg3: memref<32x32xf32, #tpu.memory_space<vmem>>, %arg4: memref<1x32xf32, #tpu.memory_space<vmem>>, %arg5: memref<32x128xf32, #tpu.memory_space<vmem>>, %arg6: memref<1x128xf32, #tpu.memory_space<vmem>>, %arg7: memref<128x32xf32, #tpu.memory_space<vmem>>, %arg8: memref<1x32xf32, #tpu.memory_space<vmem>>, %arg9: memref<1x32xf32, #tpu.memory_space<vmem>>, %arg10: memref<1x32xf32, #tpu.memory_space<vmem>>, %arg11: memref<1x32xf32, #tpu.memory_space<vmem>>, %arg12: memref<1x32xf32, #tpu.memory_space<vmem>>, %arg13: memref<2x8x32xf32, #tpu.memory_space<vmem>>) attributes {dimension_semantics = [], scalar_prefetch = 0 : i64, scratch_operands = 0 : i64, tpu.core_type = #tpu.core_type<tc>} {
    %c0 = arith.constant 0 : index
    %c0_0 = arith.constant 0 : index
    %c0_1 = arith.constant 0 : index
    %0 = vector.load %arg0[%c0, %c0_0, %c0_1] : memref<2x8x32xf32, #tpu.memory_space<vmem>>, vector<2x8x32xf32>
    %1 = vector.shape_cast %0 : vector<2x8x32xf32> to vector<16x32xf32>
    %c0_2 = arith.constant 0 : index
    %c0_3 = arith.constant 0 : index
    %2 = vector.load %arg1[%c0_2, %c0_3] : memref<32x96xf32, #tpu.memory_space<vmem>>, vector<32x96xf32>
    %cst = arith.constant dense<0.000000e+00> : vector<16x96xf32>
    %3 = tpu.matmul %1, %2, %cst {dimension_numbers = #tpu.dot_dimension_numbers<[1], [0], [0], [1], [0, 0, 1, 1], [], []>} : vector<16x32xf32>, vector<32x96xf32>, vector<16x96xf32> -> vector<16x96xf32>
    %c0_4 = arith.constant 0 : index
    %c0_5 = arith.constant 0 : index
    %4 = vector.load %arg2[%c0_4, %c0_5] : memref<1x96xf32, #tpu.memory_space<vmem>>, vector<1x96xf32>
    %5 = vector.broadcast %4 : vector<1x96xf32> to vector<16x96xf32>
    %6 = arith.addf %3, %5 : vector<16x96xf32>
    %7 = vector.extract_strided_slice %6 {offsets = [0, 0], sizes = [16, 32], strides = [1, 1]} : vector<16x96xf32> to vector<16x32xf32>
    %8 = vector.extract_strided_slice %6 {offsets = [0, 32], sizes = [16, 32], strides = [1, 1]} : vector<16x96xf32> to vector<16x32xf32>
    %9 = vector.extract_strided_slice %6 {offsets = [0, 64], sizes = [16, 32], strides = [1, 1]} : vector<16x96xf32> to vector<16x32xf32>
    %10 = vector.shape_cast %7 : vector<16x32xf32> to vector<2x8x32xf32>
    %11 = vector.extract_strided_slice %10 {offsets = [0, 0, 0], sizes = [2, 8, 8], strides = [1, 1, 1]} : vector<2x8x32xf32> to vector<2x8x8xf32>
    %12 = vector.extract_strided_slice %10 {offsets = [0, 0, 8], sizes = [2, 8, 8], strides = [1, 1, 1]} : vector<2x8x32xf32> to vector<2x8x8xf32>
    %13 = vector.extract_strided_slice %10 {offsets = [0, 0, 16], sizes = [2, 8, 8], strides = [1, 1, 1]} : vector<2x8x32xf32> to vector<2x8x8xf32>
    %14 = vector.extract_strided_slice %10 {offsets = [0, 0, 24], sizes = [2, 8, 8], strides = [1, 1, 1]} : vector<2x8x32xf32> to vector<2x8x8xf32>
    %15 = vector.shape_cast %11 : vector<2x8x8xf32> to vector<1x2x8x8xf32>
    %16 = vector.shape_cast %12 : vector<2x8x8xf32> to vector<1x2x8x8xf32>
    %17 = vector.shape_cast %13 : vector<2x8x8xf32> to vector<1x2x8x8xf32>
    %18 = vector.shape_cast %14 : vector<2x8x8xf32> to vector<1x2x8x8xf32>
    %19 = tpu.concatenate %15, %16, %17, %18 in 0 : vector<1x2x8x8xf32>, vector<1x2x8x8xf32>, vector<1x2x8x8xf32>, vector<1x2x8x8xf32> -> vector<4x2x8x8xf32>
    %20 = vector.shape_cast %19 : vector<4x2x8x8xf32> to vector<8x8x8xf32>
    %21 = vector.shape_cast %8 : vector<16x32xf32> to vector<2x8x32xf32>
    %22 = vector.extract_strided_slice %21 {offsets = [0, 0, 0], sizes = [2, 8, 8], strides = [1, 1, 1]} : vector<2x8x32xf32> to vector<2x8x8xf32>
    %23 = vector.extract_strided_slice %21 {offsets = [0, 0, 8], sizes = [2, 8, 8], strides = [1, 1, 1]} : vector<2x8x32xf32> to vector<2x8x8xf32>
    %24 = vector.extract_strided_slice %21 {offsets = [0, 0, 16], sizes = [2, 8, 8], strides = [1, 1, 1]} : vector<2x8x32xf32> to vector<2x8x8xf32>
    %25 = vector.extract_strided_slice %21 {offsets = [0, 0, 24], sizes = [2, 8, 8], strides = [1, 1, 1]} : vector<2x8x32xf32> to vector<2x8x8xf32>
    %26 = vector.shape_cast %22 : vector<2x8x8xf32> to vector<1x2x8x8xf32>
    %27 = vector.shape_cast %23 : vector<2x8x8xf32> to vector<1x2x8x8xf32>
    %28 = vector.shape_cast %24 : vector<2x8x8xf32> to vector<1x2x8x8xf32>
    %29 = vector.shape_cast %25 : vector<2x8x8xf32> to vector<1x2x8x8xf32>
    %30 = tpu.concatenate %26, %27, %28, %29 in 0 : vector<1x2x8x8xf32>, vector<1x2x8x8xf32>, vector<1x2x8x8xf32>, vector<1x2x8x8xf32> -> vector<4x2x8x8xf32>
    %31 = vector.shape_cast %30 : vector<4x2x8x8xf32> to vector<8x8x8xf32>
    %32 = vector.shape_cast %9 : vector<16x32xf32> to vector<2x8x32xf32>
    %33 = vector.extract_strided_slice %32 {offsets = [0, 0, 0], sizes = [2, 8, 8], strides = [1, 1, 1]} : vector<2x8x32xf32> to vector<2x8x8xf32>
    %34 = vector.extract_strided_slice %32 {offsets = [0, 0, 8], sizes = [2, 8, 8], strides = [1, 1, 1]} : vector<2x8x32xf32> to vector<2x8x8xf32>
    %35 = vector.extract_strided_slice %32 {offsets = [0, 0, 16], sizes = [2, 8, 8], strides = [1, 1, 1]} : vector<2x8x32xf32> to vector<2x8x8xf32>
    %36 = vector.extract_strided_slice %32 {offsets = [0, 0, 24], sizes = [2, 8, 8], strides = [1, 1, 1]} : vector<2x8x32xf32> to vector<2x8x8xf32>
    %37 = vector.shape_cast %33 : vector<2x8x8xf32> to vector<1x2x8x8xf32>
    %38 = vector.shape_cast %34 : vector<2x8x8xf32> to vector<1x2x8x8xf32>
    %39 = vector.shape_cast %35 : vector<2x8x8xf32> to vector<1x2x8x8xf32>
    %40 = vector.shape_cast %36 : vector<2x8x8xf32> to vector<1x2x8x8xf32>
    %41 = tpu.concatenate %37, %38, %39, %40 in 0 : vector<1x2x8x8xf32>, vector<1x2x8x8xf32>, vector<1x2x8x8xf32>, vector<1x2x8x8xf32> -> vector<4x2x8x8xf32>
    %42 = vector.shape_cast %41 : vector<4x2x8x8xf32> to vector<8x8x8xf32>
    "tpu.trace_start"() <{level = 10 : i32, message = "nqd,nkd->nqk"}> : () -> ()
    %cst_6 = arith.constant dense<0.000000e+00> : vector<8x8x8xf32>
    %43 = tpu.matmul %20, %31, %cst_6 {dimension_numbers = #tpu.dot_dimension_numbers<[2], [2], [1], [1], [0, 0, 0, 1, 1, 1], [0], [0]>} : vector<8x8x8xf32>, vector<8x8x8xf32>, vector<8x8x8xf32> -> vector<8x8x8xf32>
    "tpu.trace_stop"() : () -> ()
    %cst_7 = arith.constant dense<0xFF800000> : vector<8x8xf32>
    %44 = vector.multi_reduction <maximumf>, %43, %cst_7 [2] : vector<8x8x8xf32> to vector<8x8xf32>
    %45 = vector.shape_cast %44 : vector<8x8xf32> to vector<8x8x1xf32>
    %46 = vector.broadcast %45 : vector<8x8x1xf32> to vector<8x8x8xf32>
    %47 = arith.subf %43, %46 : vector<8x8x8xf32>
    %48 = math.exp %47 : vector<8x8x8xf32>
    "tpu.trace_start"() <{level = 10 : i32, message = "nqk,nkd->nqd"}> : () -> ()
    %cst_8 = arith.constant dense<0.000000e+00> : vector<8x8x8xf32>
    %49 = tpu.matmul %48, %42, %cst_8 {dimension_numbers = #tpu.dot_dimension_numbers<[2], [1], [1], [2], [0, 0, 0, 1, 1, 2], [0], [0]>} : vector<8x8x8xf32>, vector<8x8x8xf32>, vector<8x8x8xf32> -> vector<8x8x8xf32>
    "tpu.trace_stop"() : () -> ()
    %cst_9 = arith.constant dense<0.000000e+00> : vector<8x8xf32>
    %50 = vector.multi_reduction <add>, %48, %cst_9 [2] : vector<8x8x8xf32> to vector<8x8xf32>
    %51 = vector.shape_cast %50 : vector<8x8xf32> to vector<8x8x1xf32>
    %52 = tpu.reciprocal %51 {approx = true} : vector<8x8x1xf32> -> vector<8x8x1xf32>
    %53 = vector.broadcast %52 : vector<8x8x1xf32> to vector<8x8x8xf32>
    %54 = arith.mulf %49, %53 : vector<8x8x8xf32>
    %55 = vector.shape_cast %54 : vector<8x8x8xf32> to vector<4x2x8x8xf32>
    %56 = vector.extract_strided_slice %55 {offsets = [0, 0, 0, 0], sizes = [1, 2, 8, 8], strides = [1, 1, 1, 1]} : vector<4x2x8x8xf32> to vector<1x2x8x8xf32>
    %57 = vector.shape_cast %56 : vector<1x2x8x8xf32> to vector<2x8x8xf32>
    %58 = vector.extract_strided_slice %55 {offsets = [1, 0, 0, 0], sizes = [1, 2, 8, 8], strides = [1, 1, 1, 1]} : vector<4x2x8x8xf32> to vector<1x2x8x8xf32>
    %59 = vector.shape_cast %58 : vector<1x2x8x8xf32> to vector<2x8x8xf32>
    %60 = vector.extract_strided_slice %55 {offsets = [2, 0, 0, 0], sizes = [1, 2, 8, 8], strides = [1, 1, 1, 1]} : vector<4x2x8x8xf32> to vector<1x2x8x8xf32>
    %61 = vector.shape_cast %60 : vector<1x2x8x8xf32> to vector<2x8x8xf32>
    %62 = vector.extract_strided_slice %55 {offsets = [3, 0, 0, 0], sizes = [1, 2, 8, 8], strides = [1, 1, 1, 1]} : vector<4x2x8x8xf32> to vector<1x2x8x8xf32>
    %63 = vector.shape_cast %62 : vector<1x2x8x8xf32> to vector<2x8x8xf32>
    %64 = tpu.concatenate %57, %59, %61, %63 in 2 : vector<2x8x8xf32>, vector<2x8x8xf32>, vector<2x8x8xf32>, vector<2x8x8xf32> -> vector<2x8x32xf32>
    %65 = vector.shape_cast %64 : vector<2x8x32xf32> to vector<16x32xf32>
    %c0_10 = arith.constant 0 : index
    %c0_11 = arith.constant 0 : index
    %66 = vector.load %arg3[%c0_10, %c0_11] : memref<32x32xf32, #tpu.memory_space<vmem>>, vector<32x32xf32>
    %cst_12 = arith.constant dense<0.000000e+00> : vector<16x32xf32>
    %67 = tpu.matmul %65, %66, %cst_12 {dimension_numbers = #tpu.dot_dimension_numbers<[1], [0], [0], [1], [0, 0, 1, 1], [], []>} : vector<16x32xf32>, vector<32x32xf32>, vector<16x32xf32> -> vector<16x32xf32>
    %c0_13 = arith.constant 0 : index
    %c0_14 = arith.constant 0 : index
    %68 = vector.load %arg4[%c0_13, %c0_14] : memref<1x32xf32, #tpu.memory_space<vmem>>, vector<1x32xf32>
    %69 = vector.broadcast %68 : vector<1x32xf32> to vector<16x32xf32>
    %70 = arith.addf %67, %69 : vector<16x32xf32>
    %71 = arith.addf %1, %70 : vector<16x32xf32>
    %c0_15 = arith.constant 0 : index
    %c0_16 = arith.constant 0 : index
    %72 = vector.load %arg9[%c0_15, %c0_16] : memref<1x32xf32, #tpu.memory_space<vmem>>, vector<1x32xf32>
    %c0_17 = arith.constant 0 : index
    %c0_18 = arith.constant 0 : index
    %73 = vector.load %arg10[%c0_17, %c0_18] : memref<1x32xf32, #tpu.memory_space<vmem>>, vector<1x32xf32>
    %cst_19 = arith.constant dense<0.000000e+00> : vector<16xf32>
    %74 = vector.multi_reduction <add>, %71, %cst_19 [1] : vector<16x32xf32> to vector<16xf32>
    %75 = vector.shape_cast %74 : vector<16xf32> to vector<16x1xf32>
    %cst_20 = arith.constant 3.200000e+01 : f32
    %76 = vector.broadcast %cst_20 : f32 to vector<16x1xf32>
    %77 = arith.divf %75, %76 : vector<16x1xf32>
    %78 = vector.broadcast %77 : vector<16x1xf32> to vector<16x32xf32>
    %79 = arith.subf %71, %78 : vector<16x32xf32>
    %80 = arith.mulf %79, %79 : vector<16x32xf32>
    %cst_21 = arith.constant dense<0.000000e+00> : vector<16xf32>
    %81 = vector.multi_reduction <add>, %80, %cst_21 [1] : vector<16x32xf32> to vector<16xf32>
    %82 = vector.shape_cast %81 : vector<16xf32> to vector<16x1xf32>
    %cst_22 = arith.constant 3.200000e+01 : f32
    %83 = vector.broadcast %cst_22 : f32 to vector<16x1xf32>
    %84 = arith.divf %82, %83 : vector<16x1xf32>
    %85 = vector.broadcast %77 : vector<16x1xf32> to vector<16x32xf32>
    %86 = arith.subf %71, %85 : vector<16x32xf32>
    %cst_23 = arith.constant 9.99999974E-6 : f32
    %87 = vector.broadcast %cst_23 : f32 to vector<16x1xf32>
    %88 = arith.addf %84, %87 : vector<16x1xf32>
    %89 = math.rsqrt %88 : vector<16x1xf32>
    %90 = vector.broadcast %89 : vector<16x1xf32> to vector<16x32xf32>
    %91 = arith.mulf %86, %90 : vector<16x32xf32>
    %92 = vector.broadcast %72 : vector<1x32xf32> to vector<16x32xf32>
    %93 = arith.mulf %91, %92 : vector<16x32xf32>
    %94 = vector.broadcast %73 : vector<1x32xf32> to vector<16x32xf32>
    %95 = arith.addf %93, %94 : vector<16x32xf32>
    %c0_24 = arith.constant 0 : index
    %c0_25 = arith.constant 0 : index
    %96 = vector.load %arg5[%c0_24, %c0_25] : memref<32x128xf32, #tpu.memory_space<vmem>>, vector<32x128xf32>
    %cst_26 = arith.constant dense<0.000000e+00> : vector<16x128xf32>
    %97 = tpu.matmul %95, %96, %cst_26 {dimension_numbers = #tpu.dot_dimension_numbers<[1], [0], [0], [1], [0, 0, 1, 1], [], []>} : vector<16x32xf32>, vector<32x128xf32>, vector<16x128xf32> -> vector<16x128xf32>
    %c0_27 = arith.constant 0 : index
    %c0_28 = arith.constant 0 : index
    %98 = vector.load %arg6[%c0_27, %c0_28] : memref<1x128xf32, #tpu.memory_space<vmem>>, vector<1x128xf32>
    %99 = vector.broadcast %98 : vector<1x128xf32> to vector<16x128xf32>
    %100 = arith.addf %97, %99 : vector<16x128xf32>
    %cst_29 = arith.constant 0.000000e+00 : f32
    %101 = vector.broadcast %cst_29 : f32 to vector<16x128xf32>
    %102 = arith.maximumf %100, %101 : vector<16x128xf32>
    %c0_30 = arith.constant 0 : index
    %c0_31 = arith.constant 0 : index
    %103 = vector.load %arg7[%c0_30, %c0_31] : memref<128x32xf32, #tpu.memory_space<vmem>>, vector<128x32xf32>
    %cst_32 = arith.constant dense<0.000000e+00> : vector<16x32xf32>
    %104 = tpu.matmul %102, %103, %cst_32 {dimension_numbers = #tpu.dot_dimension_numbers<[1], [0], [0], [1], [0, 0, 1, 1], [], []>} : vector<16x128xf32>, vector<128x32xf32>, vector<16x32xf32> -> vector<16x32xf32>
    %c0_33 = arith.constant 0 : index
    %c0_34 = arith.constant 0 : index
    %105 = vector.load %arg8[%c0_33, %c0_34] : memref<1x32xf32, #tpu.memory_space<vmem>>, vector<1x32xf32>
    %106 = vector.broadcast %105 : vector<1x32xf32> to vector<16x32xf32>
    %107 = arith.addf %104, %106 : vector<16x32xf32>
    %108 = arith.addf %95, %107 : vector<16x32xf32>
    %c0_35 = arith.constant 0 : index
    %c0_36 = arith.constant 0 : index
    %109 = vector.load %arg11[%c0_35, %c0_36] : memref<1x32xf32, #tpu.memory_space<vmem>>, vector<1x32xf32>
    %c0_37 = arith.constant 0 : index
    %c0_38 = arith.constant 0 : index
    %110 = vector.load %arg12[%c0_37, %c0_38] : memref<1x32xf32, #tpu.memory_space<vmem>>, vector<1x32xf32>
    %cst_39 = arith.constant dense<0.000000e+00> : vector<16xf32>
    %111 = vector.multi_reduction <add>, %108, %cst_39 [1] : vector<16x32xf32> to vector<16xf32>
    %112 = vector.shape_cast %111 : vector<16xf32> to vector<16x1xf32>
    %cst_40 = arith.constant 3.200000e+01 : f32
    %113 = vector.broadcast %cst_40 : f32 to vector<16x1xf32>
    %114 = arith.divf %112, %113 : vector<16x1xf32>
    %115 = vector.broadcast %114 : vector<16x1xf32> to vector<16x32xf32>
    %116 = arith.subf %108, %115 : vector<16x32xf32>
    %117 = arith.mulf %116, %116 : vector<16x32xf32>
    %cst_41 = arith.constant dense<0.000000e+00> : vector<16xf32>
    %118 = vector.multi_reduction <add>, %117, %cst_41 [1] : vector<16x32xf32> to vector<16xf32>
    %119 = vector.shape_cast %118 : vector<16xf32> to vector<16x1xf32>
    %cst_42 = arith.constant 3.200000e+01 : f32
    %120 = vector.broadcast %cst_42 : f32 to vector<16x1xf32>
    %121 = arith.divf %119, %120 : vector<16x1xf32>
    %122 = vector.broadcast %114 : vector<16x1xf32> to vector<16x32xf32>
    %123 = arith.subf %108, %122 : vector<16x32xf32>
    %cst_43 = arith.constant 9.99999974E-6 : f32
    %124 = vector.broadcast %cst_43 : f32 to vector<16x1xf32>
    %125 = arith.addf %121, %124 : vector<16x1xf32>
    %126 = math.rsqrt %125 : vector<16x1xf32>
    %127 = vector.broadcast %126 : vector<16x1xf32> to vector<16x32xf32>
    %128 = arith.mulf %123, %127 : vector<16x32xf32>
    %129 = vector.broadcast %109 : vector<1x32xf32> to vector<16x32xf32>
    %130 = arith.mulf %128, %129 : vector<16x32xf32>
    %131 = vector.broadcast %110 : vector<1x32xf32> to vector<16x32xf32>
    %132 = arith.addf %130, %131 : vector<16x32xf32>
    %133 = vector.shape_cast %132 : vector<16x32xf32> to vector<2x8x32xf32>
    %c0_44 = arith.constant 0 : index
    %c0_45 = arith.constant 0 : index
    %c0_46 = arith.constant 0 : index
    %134 = vector.load %arg13[%c0_44, %c0_45, %c0_46] : memref<2x8x32xf32, #tpu.memory_space<vmem>>, vector<2x8x32xf32>
    tpu.vector_store %arg13[%c0_44, %c0_45, %c0_46], %133 {strides = array<i32>} : memref<2x8x32xf32, #tpu.memory_space<vmem>>, vector<2x8x32xf32>,
    return
  }
}

</mosaic_0001>

<bundles_post_ra>
// kernel: tpu_custom_call.1
= control target key start
LH: loop header
LB: loop body
LE: loop exit
PB: predicated region body
PF: predicated region fallthrough
CT: control target
= control target key end

     0   :  { %s1354_s0 = inlined_call_operand.vmem [shape: f32[2,8,32], index: 0, kind: input, shape index: {}]   ;;  %s1355_s1 = inlined_call_operand.vmem [shape: f32[32,96], index: 1, kind: input, shape index: {}]   ;;  %s1356_s2 = inlined_call_operand.vmem [shape: f32[1,96], index: 2, kind: input, shape index: {}]   ;;  %s1357_s3 = inlined_call_operand.vmem [shape: f32[32,32], index: 3, kind: input, shape index: {}]   ;;  %s1358_s4 = inlined_call_operand.vmem [shape: f32[1,32], index: 4, kind: input, shape index: {}]   ;;  %s1359_s5 = inlined_call_operand.vmem [shape: f32[32,128], index: 5, kind: input, shape index: {}]   ;;  %s1360_s6 = inlined_call_operand.vmem [shape: f32[1,128], index: 6, kind: input, shape index: {}]   ;;  %s1361_s7 = inlined_call_operand.vmem [shape: f32[128,32], index: 7, kind: input, shape index: {}]   ;;  %s1362_s8 = inlined_call_operand.vmem [shape: f32[1,32], index: 8, kind: input, shape index: {}]   ;;  %s1363_s9 = inlined_call_operand.vmem [shape: f32[1,32], index: 9, kind: input, shape index: {}]   ;;  %s1364_s10 = inlined_call_operand.vmem [shape: f32[1,32], index: 10, kind: input, shape index: {}]   ;;  %s1365_s11 = inlined_call_operand.vmem [shape: f32[1,32], index: 11, kind: input, shape index: {}]   ;;  %s1366_s12 = inlined_call_operand.vmem [shape: f32[1,32], index: 12, kind: input, shape index: {}]   ;;  %s1367_s13 = inlined_call_operand.hbm [shape: f32[2,8,32], index: 13, kind: output, shape index: {}]  }
   0x1   :  { %v50_v0 = vld [vmem:[%s1355_s1 + $0x18] sm:$0xff]  ;;  %v49_v1 = vld [vmem:[%s1355_s1 + $0x10] sm:$0xff]  ;;  %v48_v2 = vld [vmem:[%s1355_s1 + $0x8] sm:$0xff] }
   0x2   :  { %74 = vmatpush.msra.mxu0 %v50_v0  ;;  %v47_v3 = vld [vmem:[%s1355_s1] sm:$0xff] }
   0x4   :  { %75 = vmatpush.msra.mxu0 %v49_v1 }
   0x5   :  { %18 = vsyncpa [#allocation3], 0  ;;  %v1126_v4 = vld [vmem:[%s1354_s0] sm:$0xff]  ;;  %vm55_vm0 = vcmask 261120   ;;  %v1133_v5 = vld [vmem:[%s1354_s0 + $0x8] sm:$0xff]  ;;  %s1030_s21 = smov 104  }
   0x6   :  { %76 = vmatpush.msra.mxu0 %v48_v2  ;;  %v954_v6 = vld [vmem:[%s1356_s2] ss:$0 sm:$0xff]  ;;  %s1031_s22 = smov 120   ;;  %s1032_s23 = smov 112   ;;  %vm101_vm1 = vcmask 64512   ;;  %vm630_vm2 = vcmask 130048  }
   0x7   :  { %s1033_s0 = smov 96   ;;  %s1034_s2 = smov 64   ;;  %vm633_vm3 = vcmask 195584  }
   0x8   :  { %77 = vmatpush.msra.mxu0 %v47_v3  ;;  %s1035_s24 = smov 8   ;;  %s1036_s25 = smov 16  }
   0x9   :  { %898 = vmatmul.msk.f32.vlgmr.msra.gmra.mxu0 %vm55_vm0, %v1126_v4  ;;  %s1037_s26 = smov 24  }
  0x11   :  { %899 = vmatmul.msk.f32.gmra.mxu0 %vm55_vm0, %v1133_v5 }
  0x86   :  { %v79_v7 = vpop.f32.mrf.mxu0 }
  0x87   :  { %v80_v8 = vadd.f32 %v954_v6, %v79_v7 }
  0x89   :  { %95 = vrot.lane.b32.xlu2 %v80_v8, %s1030_s21  ;;  %87 = vrot.lane.b32.xlu0 %v80_v8, %s1031_s22 }
  0x8e   :  { %v82_v9 = vpop.f32.mrf.mxu0 }
  0x8f   :  { %v1140_v10 = vadd.f32 %v954_v6, %v82_v9 }
  0x91   :  { %93 = vrot.lane.b32.xlu1 %v1140_v10, %s1032_s23  ;;  %97 = vrot.lane.b32.xlu2 %v1140_v10, %s1030_s21  ;;  %s886_s21 = sshll.u32 %s1367_s13, 4  ;;  %s887_s21 = int_to_ptr.hbm [resolvable:$true] %s886_s21 }
  0x92   :  { %89 = vrot.lane.b32.xlu0 %v1140_v10, %s1031_s22  ;;  %s1039_s22 = smov [#allocation2]  }
  0x99   :  { %91 = vrot.lane.b32.xlu1 %v80_v8, %s1032_s23  ;;  %s884_s23 = sshll.u32 %s1039_s22, 4  ;;  %s885_s23 = int_to_ptr.vmem [resolvable:$true] %s884_s23 }
  0x9a   :  { %99 = vrot.lane.b32.xlu0 %v80_v8, %s1033_s0 }
  0xa1   :  { %126 = vrot.lane.b32.xlu1 %v1140_v10, %s1033_s0 }
  0xe3   :  { %v1146_v12 = vpop.permute.xlu2 %95 }
  0xe4   :  { %v949_v49 = vpack.i.bf16 %v1146_v12, %v1140_v10 }
  0xeb   :  { %v1154_v15 = vpop.permute.xlu2 %97 }
  0xfb   :  { %v88_v11 = vpop.permute.xlu0 %87 }
  0xfc   :  { %152 = vrot.lane.b32.xlu2 %v88_v11, %s1033_s0  ;;  %v939_v18 = vpack.i.bf16 %v88_v11, %v80_v8 }
 0x103   :  { %v1148_v13 = vpop.permute.xlu1 %93 }
 0x104   :  { %v1150_v14 = vpop.permute.xlu0 %89  ;;  %230 = vrot.lane.b32.xlu1 %v1148_v13, %s1033_s0 }
 0x105   :  { %178 = vrot.lane.b32.xlu0 %v1150_v14, %s1033_s0 }
 0x10b   :  { %v1156_v16 = vpop.permute.xlu1 %91 }
 0x10c   :  { %v100_v17 = vpop.permute.xlu0 %99  ;;  %282 = vrot.lane.b32.xlu1 %v1154_v15, %s1033_s0  ;;  %204 = vrot.lane.b32.xlu2 %v1156_v16, %s1033_s0  ;;  %v944_v50 = vpack.i.bf16 %v1150_v14, %v1156_v16 }
 0x10d   :  { %256 = vrot.lane.b32.xlu0 %v1146_v12, %s1033_s0  ;;  %900 = vmatpush.xpose.msk.msra.mxu2 %vm101_vm1, %v100_v17 }
 0x110   :  { %901 = vmatmul.msk.f32.vlgmr.msra.gmra.mxu2 %vm101_vm1, %v80_v8 }
 0x113   :  { %v127_v19 = vpop.permute.xlu1 %126 }
 0x114   :  { %940 = vrot.lane.b32.xlu2 %v939_v18, %s1034_s2  ;;  %902 = vmatpush.xpose.msk.msrb.mxu2 %vm101_vm1, %v127_v19 }
 0x118   :  { %903 = vmatmul.msk.f32.vlgmr.msrb.gmra.mxu2 %vm101_vm1, %v1140_v10 }
 0x156   :  { %v153_v20 = vpop.permute.xlu2 %152 }
 0x157   :  { %904 = vmatpush.xpose.msk.msra.mxu3 %vm101_vm1, %v153_v20 }
 0x15a   :  { %905 = vmatmul.msk.f32.vlgmr.msra.gmra.mxu3 %vm101_vm1, %v88_v11 }
 0x166   :  { %v205_v21 = vpop.permute.xlu2 %204 }
 0x16e   :  { %v941_v22 = vpop.permute.xlu2 %940 }
 0x16f   :  { %v943_v23 = vunpack.i.h.bf16 %v941_v22  ;;  %v942_v27 = vunpack.i.l.bf16 %v941_v22 }
 0x171   :  { %429 = vmatpush.msra.mxu1 %v943_v23 }
 0x176   :  { %v231_v24 = vpop.permute.xlu1 %230 }
 0x177   :  { %v179_v25 = vpop.permute.xlu0 %178  ;;  %910 = vmatpush.xpose.msk.msrb.mxu3 %vm101_vm1, %v231_v24 }
 0x178   :  { %906 = vmatpush.xpose.msk.msra.mxu2 %vm101_vm1, %v179_v25 }
 0x17a   :  { %911 = vmatmul.msk.f32.vlgmr.msrb.gmra.mxu3 %vm101_vm1, %v1148_v13 }
 0x17b   :  { %907 = vmatmul.msk.f32.vlgmr.msra.gmra.mxu2 %vm101_vm1, %v1150_v14 }
 0x17c   :  { %908 = vmatpush.xpose.msk.msrb.mxu2 %vm101_vm1, %v205_v21 }
 0x17e   :  { %v283_v26 = vpop.permute.xlu1 %282 }
 0x17f   :  { %v257_v28 = vpop.permute.xlu0 %256 }
 0x180   :  { %914 = vmatpush.xpose.msk.msra.mxu2 %vm101_vm1, %v283_v26  ;;  %912 = vmatpush.xpose.msk.msra.mxu3 %vm101_vm1, %v257_v28 }
 0x183   :  { %909 = vmatmul.msk.f32.vlgmr.msrb.gmra.mxu2 %vm101_vm1, %v1156_v16  ;;  %913 = vmatmul.msk.f32.vlgmr.msra.gmra.mxu3 %vm101_vm1, %v1146_v12 }
 0x184   :  { %377 = vmatpush.msrb.mxu3 %v942_v27 }
 0x18b   :  { %915 = vmatmul.msk.f32.vlgmr.msra.gmra.mxu2 %vm101_vm1, %v1154_v15 }
 0x193   :  { %v123_v29 = vpop.f32.mrf.mxu2 }
 0x194   :  { %v308_v30 = vsel %vm101_vm1, %v123_v29, -inf }
 0x195   :  { %309 = vmax.xlane.f32.xlu2 %v308_v30 }
 0x19b   :  { %v149_v31 = vpop.f32.mrf.mxu2 }
 0x19c   :  { %v311_v32 = vsel %vm101_vm1, %v149_v31, -inf }
 0x19d   :  { %312 = vmax.xlane.f32.xlu0 %v311_v32 }
 0x1dd   :  { %v175_v33 = vpop.f32.mrf.mxu3 }
 0x1de   :  { %v314_v34 = vsel %vm101_vm1, %v175_v33, -inf }
 0x1df   :  { %315 = vmax.xlane.f32.xlu0 %v314_v34 }
 0x1fd   :  { %v253_v35 = vpop.f32.mrf.mxu3 }
 0x1fe   :  { %v201_v36 = vpop.f32.mrf.mxu2  ;;  %v323_v37 = vsel %vm101_vm1, %v253_v35, -inf }
 0x1ff   :  { %324 = vmax.xlane.f32.xlu0 %v323_v37  ;;  %v317_v38 = vsel %vm101_vm1, %v201_v36, -inf }
 0x200   :  { %318 = vmax.xlane.f32.xlu2 %v317_v38 }
 0x206   :  { %v227_v39 = vpop.f32.mrf.mxu2  ;;  %v279_v44 = vpop.f32.mrf.mxu3 }
 0x207   :  { %v320_v40 = vsel %vm101_vm1, %v227_v39, -inf  ;;  %v326_v47 = vsel %vm101_vm1, %v279_v44, -inf }
 0x208   :  { %v310_v41 = vpop.xlane.xlu2 %309  ;;  %321 = vmax.xlane.f32.xlu1 %v320_v40 }
 0x209   :  { %v332_v42 = vsub.f32 %v123_v29, %v310_v41 }
 0x20b   :  { %v340_v43 = vmul.f32 1.442695, %v332_v42 }
 0x20d   :  { %962 = vpow2.f32 %v340_v43 }
 0x20e   :  { %v305_v45 = vpop.f32.mrf.mxu2 }
 0x20f   :  { %v329_v46 = vsel %vm101_vm1, %v305_v45, -inf }
 0x210   :  { %330 = vmax.xlane.f32.xlu0 %v329_v46  ;;  %327 = vmax.xlane.f32.xlu1 %v326_v47  ;;  %v313_v51 = vpop.xlane.xlu0 %312 }
 0x211   :  { %v333_v57 = vsub.f32 %v149_v31, %v313_v51 }
 0x213   :  { %v1192_v48 = vpop.eup %962  ;;  %v342_v58 = vmul.f32 1.442695, %v333_v57 }
 0x214   :  { %916 = vmatmul.msk.f32.vlgmr.msrb.gmra.mxu3 %vm101_vm1, %v1192_v48  ;;  %v564_v27 = vsel %vm101_vm1, %v1192_v48, 0.0 }
 0x218   :  { %950 = vrot.lane.b32.xlu2 %v949_v49, %s1034_s2 }
 0x220   :  { %486 = vrot.lane.b32.xlu2 %v1148_v13, %s1034_s2 }
 0x224   :  { %538 = vrot.lane.b32.xlu0 %v1154_v15, %s1034_s2 }
 0x229   :  { %945 = vrot.lane.b32.xlu1 %v944_v50, %s1034_s2 }
 0x252   :  { %v316_v52 = vpop.xlane.xlu0 %315 }
 0x253   :  { %v334_v53 = vsub.f32 %v175_v33, %v316_v52 }
 0x255   :  { %v344_v54 = vmul.f32 1.442695, %v334_v53 }
 0x257   :  { %964 = vpow2.f32 %v344_v54 }
 0x258   :  { %966 = vpow2.f32 %v342_v58 }
 0x25d   :  { %v965_v55 = vpop.eup %964 }
 0x25e   :  { %918 = vmatmul.msk.f32.vlgmr.msra.gmra.mxu1 %vm101_vm1, %v965_v55  ;;  %v570_v56 = vsel %vm101_vm1, %v965_v55, 0.0  ;;  %v967_v8 = vpop.eup %966 }
 0x25f   :  { %571 = vadd.xlane.f32.xlu1 %v570_v56  ;;  %v567_v28 = vsel %vm101_vm1, %v967_v8, 0.0 }
 0x272   :  { %v325_v61 = vpop.xlane.xlu0 %324 }
 0x273   :  { %v319_v59 = vpop.xlane.xlu2 %318  ;;  %v337_v63 = vsub.f32 %v253_v35, %v325_v61  ;;  %v637_v61 = vld [vmem:[%s1357_s3 + $0x8] sm:$0xff] }
 0x274   :  { %v335_v60 = vsub.f32 %v201_v36, %v319_v59  ;;  %v639_v59 = vld [vmem:[%s1357_s3 + $0x18] sm:$0xff] }
 0x275   :  { %v350_v0 = vmul.f32 1.442695, %v337_v63 }
 0x276   :  { %v346_v62 = vmul.f32 1.442695, %v335_v60  ;;  %v638_v60 = vld [vmem:[%s1357_s3 + $0x10] sm:$0xff] }
 0x278   :  { %968 = vpow2.f32 %v346_v62  ;;  %v636_v62 = vld [vmem:[%s1357_s3] sm:$0xff] }
 0x279   :  { %970 = vpow2.f32 %v350_v0 }
 0x27b   :  { %v951_v1 = vpop.permute.xlu2 %950  ;;  %v322_v2 = vpop.xlane.xlu1 %321 }
 0x27c   :  { %v336_v3 = vsub.f32 %v227_v39, %v322_v2  ;;  %v952_v6 = vunpack.i.l.bf16 %v951_v1  ;;  %v953_v7 = vunpack.i.h.bf16 %v951_v1 }
 0x27e   :  { %v969_v9 = vpop.eup %968  ;;  %v348_v10 = vmul.f32 1.442695, %v336_v3  ;;  %403 = vmatpush.msrb.mxu0 %v952_v6  ;;  %533 = vmatpush.msrb.mxu1 %v953_v7 }
 0x27f   :  { %917 = vmatmul.msk.f32.vlgmr.msrb.gmra.mxu0 %vm101_vm1, %v967_v8  ;;  %v573_v11 = vsel %vm101_vm1, %v969_v9, 0.0  ;;  %v971_v16 = vpop.eup %970 }
 0x280   :  { %972 = vpow2.f32 %v348_v10  ;;  %574 = vadd.xlane.f32.xlu1 %v573_v11  ;;  %v579_v25 = vsel %vm101_vm1, %v971_v16, 0.0 }
 0x283   :  { %v487_v12 = vpop.permute.xlu2 %486  ;;  %v328_v13 = vpop.xlane.xlu1 %327 }
 0x284   :  { %v338_v14 = vsub.f32 %v279_v44, %v328_v13  ;;  %v331_v15 = vpop.xlane.xlu0 %330  ;;  %507 = vmatpush.msra.mxu0 %v487_v12 }
 0x285   :  { %v339_v17 = vsub.f32 %v305_v45, %v331_v15 }
 0x286   :  { %v973_v18 = vpop.eup %972  ;;  %v352_v19 = vmul.f32 1.442695, %v338_v14 }
 0x287   :  { %v354_v20 = vmul.f32 1.442695, %v339_v17  ;;  %921 = vmatmul.msk.f32.vlgmr.msra.gmra.mxu0 %vm101_vm1, %v971_v16  ;;  %v576_v21 = vsel %vm101_vm1, %v973_v18, 0.0 }
 0x288   :  { %974 = vpow2.f32 %v352_v19  ;;  %577 = vadd.xlane.f32.xlu2 %v576_v21  ;;  %v955_v19 = vld [vmem:[%s1358_s4] ss:$0 sm:$0xff] }
 0x289   :  { %976 = vpow2.f32 %v354_v20 }
 0x28e   :  { %v975_v22 = vpop.eup %974 }
 0x28f   :  { %v977_v23 = vpop.eup %976  ;;  %922 = vmatmul.msk.f32.vlgmr.msrb.gmra.mxu1 %vm101_vm1, %v975_v22  ;;  %v582_v24 = vsel %vm101_vm1, %v975_v22, 0.0 }
 0x290   :  { %583 = vadd.xlane.f32.xlu0 %v582_v24  ;;  %580 = vadd.xlane.f32.xlu2 %v579_v25  ;;  %v585_v26 = vsel %vm101_vm1, %v977_v23, 0.0 }
 0x291   :  { %586 = vadd.xlane.f32.xlu1 %v585_v26 }
 0x296   :  { %v539_v32 = vpop.permute.xlu0 %538 }
 0x297   :  { %v379_v48 = vpop.f32.mrf.mxu3 }
 0x298   :  { %565 = vadd.xlane.f32.xlu0 %v564_v27  ;;  %568 = vadd.xlane.f32.xlu2 %v567_v28  ;;  %v1038_v28 = vmov 32.0  }
 0x29b   :  { %v946_v29 = vpop.permute.xlu1 %945 }
 0x29c   :  { %v948_v30 = vunpack.i.h.bf16 %v946_v29  ;;  %v947_v31 = vunpack.i.l.bf16 %v946_v29 }
 0x29e   :  { %455 = vmatpush.msrb.mxu2 %v948_v30  ;;  %481 = vmatpush.msra.mxu3 %v947_v31 }
 0x29f   :  { %919 = vmatmul.msk.f32.vlgmr.msrb.gmra.mxu2 %vm101_vm1, %v969_v9  ;;  %920 = vmatmul.msk.f32.vlgmr.msra.gmra.mxu3 %vm101_vm1, %v973_v18 }
 0x2a0   :  { %559 = vmatpush.msra.mxu2 %v539_v32  ;;  %662 = vmatpush.msrb.mxu3 %v639_v59  ;;  %v788_v59 = vld [vmem:[%s1361_s7 + $0x58] sm:$0xff] }
 0x2a2   :  { %663 = vmatpush.msrb.mxu3 %v638_v60 }
 0x2a4   :  { %664 = vmatpush.msrb.mxu3 %v637_v61  ;;  %v787_v61 = vld [vmem:[%s1361_s7 + $0x50] sm:$0xff] }
 0x2a6   :  { %665 = vmatpush.msrb.mxu3 %v636_v62 }
 0x2a7   :  { %923 = vmatmul.msk.f32.vlgmr.msra.gmra.mxu2 %vm101_vm1, %v977_v23 }
 0x2d2   :  { %v572_v33 = vpop.xlane.xlu1 %571 }
 0x2d3   :  { %978 = vrcp.f32 %v572_v33 }
 0x2d9   :  { %v979_v34 = vpop.eup %978 }
 0x2db   :  { %v431_v35 = vpop.f32.mrf.mxu1 }
 0x2dc   :  { %v598_v36 = vmul.f32 %v979_v34, %v431_v35 }
 0x2de   :  { %606 = vrot.lane.b32.xlu1 %v598_v36, %s1035_s24 }
 0x2f3   :  { %v575_v47 = vpop.xlane.xlu1 %574 }
 0x2fb   :  { %v578_v37 = vpop.xlane.xlu2 %577 }
 0x2fc   :  { %v405_v38 = vpop.f32.mrf.mxu0 }
 0x303   :  { %v581_v39 = vpop.xlane.xlu2 %580  ;;  %v584_v40 = vpop.xlane.xlu0 %583 }
 0x304   :  { %980 = vrcp.f32 %v581_v39  ;;  %v509_v42 = vpop.f32.mrf.mxu0  ;;  %v587_v49 = vpop.xlane.xlu1 %586 }
 0x305   :  { %982 = vrcp.f32 %v584_v40 }
 0x306   :  { %984 = vrcp.f32 %v578_v37 }
 0x307   :  { %986 = vrcp.f32 %v575_v47 }
 0x308   :  { %988 = vrcp.f32 %v587_v49 }
 0x30a   :  { %v981_v41 = vpop.eup %980 }
 0x30b   :  { %v601_v43 = vmul.f32 %v981_v41, %v509_v42  ;;  %v983_v44 = vpop.eup %982  ;;  %v566_v63 = vpop.xlane.xlu0 %565 }
 0x30c   :  { %v535_v45 = vpop.f32.mrf.mxu1  ;;  %v985_v50 = vpop.eup %984  ;;  %990 = vrcp.f32 %v566_v63  ;;  %v786_v63 = vld [vmem:[%s1361_s7 + $0x48] sm:$0xff] }
 0x30d   :  { %v602_v46 = vmul.f32 %v983_v44, %v535_v45  ;;  %616 = vrot.lane.b32.xlu1 %v601_v43, %s1036_s25  ;;  %v987_v54 = vpop.eup %986  ;;  %v569_v0 = vpop.xlane.xlu2 %568  ;;  %v741_v43 = vld [vmem:[%s1359_s5 + $0x18] sm:$0xff]  ;;  %v740_v44 = vld [vmem:[%s1359_s5 + $0x10] sm:$0xff]  ;;  %v739_v45 = vld [vmem:[%s1359_s5 + $0x8] sm:$0xff] }
 0x30e   :  { %v989_v55 = vpop.eup %988  ;;  %992 = vrcp.f32 %v569_v0  ;;  %764 = vmatpush.msrb.mxu0 %v741_v43 }
 0x30f   :  { %622 = vrot.lane.b32.xlu2 %v602_v46, %s1037_s26  ;;  %994 = vrcp.f32 %v1038_v28  ;;  %v738_v46 = vld [vmem:[%s1359_s5] sm:$0xff] }
 0x310   :  { %765 = vmatpush.msrb.mxu0 %v740_v44  ;;  %v777_v28 = vld [vmem:[%s1361_s7] sm:$0xff] }
 0x312   :  { %v991_v1 = vpop.eup %990  ;;  %766 = vmatpush.msrb.mxu0 %v739_v45 }
 0x313   :  { %v596_v3 = vmul.f32 %v991_v1, %v379_v48  ;;  %v785_v1 = vld [vmem:[%s1361_s7 + $0x40] sm:$0xff] }
 0x314   :  { %v993_v11 = vpop.eup %992  ;;  %767 = vmatpush.msrb.mxu0 %v738_v46 }
 0x315   :  { %v597_v12 = vmul.f32 %v993_v11, %v405_v38  ;;  %v995_v29 = vpop.eup %994 }
 0x316   :  { %v684_v30 = vmul.f32 32.0, %v995_v29  ;;  %vm688_vm4 = vweird.f32 %v995_v29 }
 0x318   :  { %v685_v31 = vsub.f32 1.0, %v684_v30 }
 0x31a   :  { %v686_v32 = vmul.f32 %v995_v29, %v685_v31 }
 0x31c   :  { %v687_v33 = vadd.f32 %v995_v29, %v686_v32 }
 0x31e   :  { %v1247_v34 = vsel %vm688_vm4, %v995_v29, %v687_v33  ;;  %v958_v29 = vld [vmem:[%s1360_s6] ss:$0 sm:$0xff] }
 0x322   :  { %v457_v51 = vpop.f32.mrf.mxu2  ;;  %v483_v52 = vpop.f32.mrf.mxu3 }
 0x323   :  { %v600_v53 = vmul.f32 %v985_v50, %v483_v52  ;;  %v599_v57 = vmul.f32 %v987_v54, %v457_v51  ;;  %v792_v50 = vld [vmem:[%s1361_s7 + $0x78] sm:$0xff]  ;;  %v791_v51 = vld [vmem:[%s1361_s7 + $0x70] sm:$0xff]  ;;  %v790_v52 = vld [vmem:[%s1361_s7 + $0x68] sm:$0xff] }
 0x324   :  { %797 = vmatpush.msra.mxu1 %v792_v50 }
 0x325   :  { %614 = vrot.lane.b32.xlu0 %v600_v53, %s1036_s25 }
 0x326   :  { %798 = vmatpush.msra.mxu1 %v791_v51 }
 0x328   :  { %799 = vmatpush.msra.mxu1 %v790_v52 }
 0x32a   :  { %v561_v56 = vpop.f32.mrf.mxu2 }
 0x32b   :  { %v603_v58 = vmul.f32 %v989_v55, %v561_v56  ;;  %v789_v55 = vld [vmem:[%s1361_s7 + $0x60] sm:$0xff] }
 0x32c   :  { %800 = vmatpush.msra.mxu1 %v789_v55 }
 0x32d   :  { %608 = vrot.lane.b32.xlu0 %v599_v57, %s1035_s24  ;;  %624 = vrot.lane.b32.xlu2 %v603_v58, %s1037_s26 }
 0x32e   :  { %801 = vmatpush.msra.mxu1 %v788_v59 }
 0x330   :  { %802 = vmatpush.msra.mxu1 %v787_v61 }
 0x332   :  { %803 = vmatpush.msra.mxu1 %v786_v63 }
 0x334   :  { %804 = vmatpush.msra.mxu1 %v785_v1 }
 0x350   :  { %v607_v2 = vpop.permute.xlu1 %606 }
 0x351   :  { %v628_v6 = vsel %vm101_vm1, %v596_v3, %v607_v2 }
 0x369   :  { %v623_v8 = vpop.permute.xlu2 %622 }
 0x37f   :  { %v617_v14 = vpop.permute.xlu1 %616 }
 0x387   :  { %v625_v16 = vpop.permute.xlu2 %624 }
 0x397   :  { %v615_v7 = vpop.permute.xlu0 %614 }
 0x398   :  { %v631_v9 = vsel %vm630_vm2, %v628_v6, %v615_v7  ;;  %v784_v6 = vld [vmem:[%s1361_s7 + $0x38] sm:$0xff]  ;;  %v956_v7 = vld [vmem:[%s1363_s9] ss:$0 sm:$0xff] }
 0x399   :  { %v634_v10 = vsel %vm633_vm3, %v631_v9, %v623_v8  ;;  %805 = vmatpush.msra.mxu1 %v784_v6 }
 0x39a   :  { %924 = vmatmul.msk.f32.vlgmr.msrb.gmra.mxu3 %vm55_vm0, %v634_v10  ;;  %v783_v10 = vld [vmem:[%s1361_s7 + $0x30] sm:$0xff] }
 0x39b   :  { %806 = vmatpush.msra.mxu1 %v783_v10 }
 0x39f   :  { %v609_v13 = vpop.permute.xlu0 %608 }
 0x3a0   :  { %v629_v15 = vsel %vm101_vm1, %v597_v12, %v609_v13  ;;  %v957_v13 = vld [vmem:[%s1364_s10] ss:$0 sm:$0xff] }
 0x3a1   :  { %v632_v17 = vsel %vm630_vm2, %v629_v15, %v617_v14  ;;  %v782_v14 = vld [vmem:[%s1361_s7 + $0x28] sm:$0xff] }
 0x3a2   :  { %v635_v18 = vsel %vm633_vm3, %v632_v17, %v625_v16  ;;  %v781_v17 = vld [vmem:[%s1361_s7 + $0x20] sm:$0xff]  ;;  %807 = vmatpush.msra.mxu1 %v782_v14 }
 0x3a3   :  { %925 = vmatmul.msk.f32.gmra.mxu3 %vm55_vm0, %v635_v18 }
 0x3a4   :  { %808 = vmatpush.msra.mxu1 %v781_v17 }
 0x41d   :  { %v667_v20 = vpop.f32.mrf.mxu3 }
 0x41e   :  { %v668_v21 = vadd.f32 %v955_v19, %v667_v20  ;;  %v780_v20 = vld [vmem:[%s1361_s7 + $0x18] sm:$0xff] }
 0x41f   :  { %809 = vmatpush.msra.mxu1 %v780_v20 }
 0x420   :  { %v673_v22 = vadd.f32 %v668_v21, %v1126_v4 }
 0x422   :  { %v677_v23 = vsel %vm55_vm0, %v673_v22, 0.0 }
 0x423   :  { %678 = vadd.xlane.f32.xlu0 %v677_v23 }
 0x426   :  { %v670_v24 = vpop.f32.mrf.mxu3 }
 0x427   :  { %v671_v25 = vadd.f32 %v955_v19, %v670_v24 }
 0x429   :  { %v674_v26 = vadd.f32 %v671_v25, %v1133_v5 }
 0x42b   :  { %v680_v27 = vsel %vm55_vm0, %v674_v26, 0.0 }
 0x42c   :  { %681 = vadd.xlane.f32.xlu1 %v680_v27  ;;  %v778_v27 = vld [vmem:[%s1361_s7 + $0x8] sm:$0xff] }
 0x496   :  { %v679_v4 = vpop.xlane.xlu0 %678 }
 0x497   :  { %v690_v35 = vmul.f32 %v1247_v34, %v679_v4 }
 0x499   :  { %v692_v36 = vsub.f32 %v673_v22, %v690_v35 }
 0x49b   :  { %v694_v37 = vmul.f32 %v692_v36, %v692_v36 }
 0x49d   :  { %v696_v5 = vsel %vm55_vm0, %v694_v37, 0.0 }
 0x49e   :  { %697 = vadd.xlane.f32.xlu2 %v696_v5 }
 0x49f   :  { %v682_v38 = vpop.xlane.xlu1 %681 }
 0x4a0   :  { %v691_v39 = vmul.f32 %v1247_v34, %v682_v38 }
 0x4a2   :  { %v1252_v40 = vsub.f32 %v674_v26, %v691_v39  ;;  %v779_v26 = vld [vmem:[%s1361_s7 + $0x10] sm:$0xff] }
 0x4a3   :  { %810 = vmatpush.msra.mxu1 %v779_v26 }
 0x4a4   :  { %v695_v41 = vmul.f32 %v1252_v40, %v1252_v40 }
 0x4a5   :  { %811 = vmatpush.msra.mxu1 %v778_v27 }
 0x4a6   :  { %v699_v42 = vsel %vm55_vm0, %v695_v41, 0.0 }
 0x4a7   :  { %700 = vadd.xlane.f32.xlu0 %v699_v42  ;;  %812 = vmatpush.msra.mxu1 %v777_v28 }
 0x511   :  { %v698_v47 = vpop.xlane.xlu2 %697 }
 0x512   :  { %v702_v48 = vmul.f32 %v698_v47, %v1247_v34 }
 0x514   :  { %v704_v49 = vadd.f32 1e-05, %v702_v48 }
 0x516   :  { %996 = vrsqrt.f32 %v704_v49  ;;  %vm712_vm6 = vweird.f32 %v704_v49 }
 0x51a   :  { %v701_v53 = vpop.xlane.xlu0 %700 }
 0x51b   :  { %v703_v54 = vmul.f32 %v701_v53, %v1247_v34 }
 0x51c   :  { %v997_v56 = vpop.eup %996 }
 0x51d   :  { %v707_v57 = vmul.f32 %v997_v56, %v704_v49  ;;  %v705_v58 = vadd.f32 1e-05, %v703_v54  ;;  %vm713_vm5 = vweird.f32 %v997_v56 }
 0x51e   :  { %vm714_vm7 = vmor %vm712_vm6, %vm713_vm5 }
 0x51f   :  { %v708_v60 = vmul.f32 %v997_v56, %v707_v57  ;;  %998 = vrsqrt.f32 %v705_v58  ;;  %vm722_vm9 = vweird.f32 %v705_v58 }
 0x521   :  { %v709_v62 = vmul.f32 0.5, %v708_v60 }
 0x523   :  { %v710_v0 = vsub.f32 1.5, %v709_v62 }
 0x525   :  { %v999_v2 = vpop.eup %998  ;;  %v711_v3 = vmul.f32 %v997_v56, %v710_v0 }
 0x526   :  { %v717_v8 = vmul.f32 %v999_v2, %v705_v58  ;;  %vm723_vm8 = vweird.f32 %v999_v2 }
 0x527   :  { %v715_v9 = vsel %vm714_vm7, %v997_v56, %v711_v3  ;;  %vm724_vm10 = vmor %vm722_vm9, %vm723_vm8  ;;  %v960_v3 = vld [vmem:[%s1365_s11] ss:$0 sm:$0xff] }
 0x528   :  { %v726_v11 = vmul.f32 %v715_v9, %v692_v36  ;;  %v718_v12 = vmul.f32 %v999_v2, %v717_v8  ;;  %v959_v36 = vld [vmem:[%s1362_s8] ss:$0 sm:$0xff] }
 0x529   :  { %v961_v9 = vld [vmem:[%s1366_s12] ss:$0 sm:$0xff]  ;;  %s1040_s12 = smov 128  }
 0x52a   :  { %v731_v15 = vmul.f32 %v956_v7, %v726_v11  ;;  %v719_v16 = vmul.f32 0.5, %v718_v12 }
 0x52c   :  { %v720_v18 = vsub.f32 1.5, %v719_v16  ;;  %v736_v19 = vadd.f32 %v957_v13, %v731_v15 }
 0x52e   :  { %v721_v21 = vmul.f32 %v999_v2, %v720_v18  ;;  %926 = vmatmul.msk.f32.vlgmr.msrb.gmra.mxu0 %vm55_vm0, %v736_v19 }
 0x530   :  { %v725_v22 = vsel %vm724_vm10, %v999_v2, %v721_v21 }
 0x531   :  { %v727_v23 = vmul.f32 %v725_v22, %v1252_v40 }
 0x533   :  { %v732_v24 = vmul.f32 %v956_v7, %v727_v23 }
 0x535   :  { %v737_v25 = vadd.f32 %v957_v13, %v732_v24 }
 0x537   :  { %927 = vmatmul.msk.f32.gmra.mxu0 %vm55_vm0, %v737_v25 }
 0x5ab   :  { %v769_v30 = vpop.f32.mrf.mxu0 }
 0x5ac   :  { %v770_v31 = vadd.f32 %v958_v29, %v769_v30 }
 0x5ae   :  { %v775_v32 = vmax.f32 %v770_v31, 0.0 }
 0x5b0   :  { %813 = vmatmul.f32.vlgmr.msra.gmra.mxu1 %v775_v32 }
 0x5b4   :  { %v772_v33 = vpop.f32.mrf.mxu0 }
 0x5b5   :  { %v773_v4 = vadd.f32 %v958_v29, %v772_v33 }
 0x5b7   :  { %v776_v35 = vmax.f32 %v773_v4, 0.0 }
 0x5b9   :  { %816 = vmatmul.f32.gmra.mxu1 %v776_v35 }
 0x62d   :  { %v814_v37 = vpop.f32.mrf.mxu1 }
 0x62e   :  { %v815_v5 = vadd.f32 %v959_v36, %v814_v37 }
 0x630   :  { %v820_v38 = vadd.f32 %v815_v5, %v736_v19 }
 0x632   :  { %v824_v39 = vsel %vm55_vm0, %v820_v38, 0.0 }
 0x633   :  { %825 = vadd.xlane.f32.xlu1 %v824_v39 }
 0x636   :  { %v817_v40 = vpop.f32.mrf.mxu1 }
 0x637   :  { %v818_v41 = vadd.f32 %v959_v36, %v817_v40 }
 0x639   :  { %v821_v42 = vadd.f32 %v818_v41, %v737_v25 }
 0x63b   :  { %v827_v43 = vsel %vm55_vm0, %v821_v42, 0.0 }
 0x63c   :  { %828 = vadd.xlane.f32.xlu2 %v827_v43 }
 0x6a6   :  { %v826_v44 = vpop.xlane.xlu1 %825 }
 0x6a7   :  { %v830_v45 = vmul.f32 %v826_v44, %v1247_v34 }
 0x6a9   :  { %v832_v46 = vsub.f32 %v820_v38, %v830_v45 }
 0x6ab   :  { %v834_v47 = vmul.f32 %v832_v46, %v832_v46 }
 0x6ad   :  { %v836_v48 = vsel %vm55_vm0, %v834_v47, 0.0 }
 0x6ae   :  { %837 = vadd.xlane.f32.xlu0 %v836_v48 }
 0x6af   :  { %v829_v49 = vpop.xlane.xlu2 %828 }
 0x6b0   :  { %v831_v50 = vmul.f32 %v829_v49, %v1247_v34 }
 0x6b2   :  { %v833_v51 = vsub.f32 %v821_v42, %v831_v50 }
 0x6b4   :  { %v835_v52 = vmul.f32 %v833_v51, %v833_v51 }
 0x6b6   :  { %v839_v53 = vsel %vm55_vm0, %v835_v52, 0.0 }
 0x6b7   :  { %840 = vadd.xlane.f32.xlu1 %v839_v53 }
 0x721   :  { %v838_v54 = vpop.xlane.xlu0 %837 }
 0x722   :  { %v842_v55 = vmul.f32 %v838_v54, %v1247_v34 }
 0x724   :  { %v844_v56 = vadd.f32 1e-05, %v842_v55 }
 0x726   :  { %1000 = vrsqrt.f32 %v844_v56  ;;  %vm852_vm12 = vweird.f32 %v844_v56 }
 0x72a   :  { %v841_v57 = vpop.xlane.xlu1 %840 }
 0x72b   :  { %v843_v58 = vmul.f32 %v841_v57, %v1247_v34 }
 0x72c   :  { %v1001_v59 = vpop.eup %1000 }
 0x72d   :  { %v847_v60 = vmul.f32 %v1001_v59, %v844_v56  ;;  %v845_v61 = vadd.f32 1e-05, %v843_v58  ;;  %vm853_vm11 = vweird.f32 %v1001_v59 }
 0x72e   :  { %vm854_vm13 = vmor %vm852_vm12, %vm853_vm11 }
 0x72f   :  { %v848_v62 = vmul.f32 %v1001_v59, %v847_v60  ;;  %1002 = vrsqrt.f32 %v845_v61  ;;  %vm862_vm15 = vweird.f32 %v845_v61 }
 0x731   :  { %v849_v63 = vmul.f32 0.5, %v848_v62 }
 0x733   :  { %v850_v0 = vsub.f32 1.5, %v849_v63 }
 0x735   :  { %v1003_v1 = vpop.eup %1002  ;;  %v851_v2 = vmul.f32 %v1001_v59, %v850_v0 }
 0x736   :  { %v857_v6 = vmul.f32 %v1003_v1, %v845_v61  ;;  %vm863_vm14 = vweird.f32 %v1003_v1 }
 0x737   :  { %v855_v7 = vsel %vm854_vm13, %v1001_v59, %v851_v2  ;;  %vm864_vm1 = vmor %vm862_vm15, %vm863_vm14 }
 0x738   :  { %v866_v8 = vmul.f32 %v855_v7, %v832_v46  ;;  %v858_v34 = vmul.f32 %v1003_v1, %v857_v6 }
 0x73a   :  { %v871_v10 = vmul.f32 %v960_v3, %v866_v8  ;;  %v859_v11 = vmul.f32 0.5, %v858_v34 }
 0x73c   :  { %v860_v12 = vsub.f32 1.5, %v859_v11  ;;  %v876_v13 = vadd.f32 %v961_v9, %v871_v10 }
 0x73e   :  { %v861_v14 = vmul.f32 %v1003_v1, %v860_v12  ;;  %878 = vst.msk [vmem:[#allocation2] sm:$0xff] %vm55_vm0, %v876_v13 }
 0x740   :  { %v865_v15 = vsel %vm864_vm1, %v1003_v1, %v861_v14 }
 0x741   :  { %v867_v16 = vmul.f32 %v865_v15, %v833_v51 }
 0x743   :  { %v872_v17 = vmul.f32 %v960_v3, %v867_v16 }
 0x745   :  { %v877_v18 = vadd.f32 %v961_v9, %v872_v17 }
 0x747   :  { %879 = vst.msk [vmem:[#allocation2 + $0x8] sm:$0xff] %vm55_vm0, %v877_v18 }
 0x748   :  { %892 = dma.vmem_to_hbm [thread:$0]  %s885_s23, 256, %s887_s21, [#allocation3], %s1040_s12, %s1040_s12, %s1035_s24  }
 0x749   :  { %1028 = dma.done.wait [#allocation3], 256  }
 0x74a   :  { %1029 = vsyncadd [#allocation3], 4294967040 }
 0x74b   :  { %897 = vsyncpa [#allocation3], 1 }

</bundles_post_ra>
